<compile_context>
chip_gen: v6e
topology: v6e:2x2x1
jax: 0.10.0
libtpu: 0.0.40
codegen_flags: <defaults>
</compile_context>

<pallas_src>
import jax
import jax.numpy as jnp
from jax.experimental import pallas as pl
from jax.experimental.pallas import tpu as pltpu


def _round_up(v, m):
    return ((v + m - 1) // m) * m


# ---------------------------------------------------------------------------
# Kernel (single variant: eps handling is folded into the stacked weights)
# ---------------------------------------------------------------------------
def _ino_kernel(act_ref, w1_ref, b1_ref, w2_ref, b2_ref, w3_ref, wskip_ref,
                bout_ref, o_ref):
    mxu_dt = w1_ref.dtype
    # layer 1: act @ w1 + b1 -> tanh    (f32 accumulate, f32 bias/tanh)
    h1 = jnp.tanh(
        jnp.dot(act_ref[...].astype(mxu_dt), w1_ref[...],
                preferred_element_type=jnp.float32) + b1_ref[...])
    # layer 2: h1 @ w2 + b2 -> tanh
    h2 = jnp.tanh(
        jnp.dot(h1.astype(mxu_dt), w2_ref[...],
                preferred_element_type=jnp.float32) + b2_ref[...])
    # output: MLP head + (skip path | innovation path) stacked, fused bias
    o_ref[...] = (
        jnp.dot(h2.astype(mxu_dt), w3_ref[...],
                preferred_element_type=jnp.float32)
        + jnp.dot(act_ref[...].astype(mxu_dt), wskip_ref[...],
                  preferred_element_type=jnp.float32)
        + bout_ref[...])


# ---------------------------------------------------------------------------
# Parameters
# ---------------------------------------------------------------------------
def init_params(key, nx, nu_prod, ny_prod, hidden):
    """PyTorch-equivalent parameters; weights stored as (in_features, out_features)."""
    ks = jax.random.split(key, 9)
    s = 0.1
    n_in = nx + nu_prod
    return {
        "wlin": jax.random.normal(ks[0], (n_in, nx), jnp.float32) * s,
        "blin": jax.random.normal(ks[1], (1, nx), jnp.float32) * s,
        "w1":   jax.random.normal(ks[2], (n_in, hidden), jnp.float32) * s,
        "b1":   jax.random.normal(ks[3], (1, hidden), jnp.float32) * s,
        "w2":   jax.random.normal(ks[4], (hidden, hidden), jnp.float32) * s,
        "b2":   jax.random.normal(ks[5], (1, hidden), jnp.float32) * s,
        "w3":   jax.random.normal(ks[6], (hidden, nx), jnp.float32) * s,
        "b3":   jax.random.normal(ks[7], (1, nx), jnp.float32) * s,
        "K":    jax.random.normal(ks[8], (ny_prod, nx), jnp.float32) * s,
    }


def prepare_kernel_params(raw, mxu_dtype=jnp.float32):
    """One-time re-layout / stacking.

    - w1_eps  = [w1; 0]     so [x|u|eps] @ w1_eps  == [x|u] @ w1        (exact)
    - wskip_eps = [wlin; K] so [x|u|eps] @ wskip_eps == net_in@wlin + eps@K (exact)
    - bout = blin + b3 (fused bias of skip + MLP head)
    MXU operands may be pre-cast to bf16 (v6e/v7x); biases stay f32.
    """
    w1, wlin, K = raw["w1"], raw["wlin"], raw["K"]
    hidden = w1.shape[1]
    ny_p = K.shape[0]
    cast = lambda w: w.astype(mxu_dtype)
    return {
        "w1":        cast(w1),
        "w1_eps":    cast(jnp.concatenate([w1, jnp.zeros((ny_p, hidden), w1.dtype)], 0)),
        "b1":        raw["b1"].astype(jnp.float32),
        "w2":        cast(raw["w2"]),
        "b2":        raw["b2"].astype(jnp.float32),
        "w3":        cast(raw["w3"]),
        "wskip":     cast(wlin),
        "wskip_eps": cast(jnp.concatenate([wlin, K], 0)),
        "bout":      (raw["blin"] + raw["b3"]).astype(jnp.float32),
    }


# ---------------------------------------------------------------------------
# Wrapper
# ---------------------------------------------------------------------------
def ino_state_net_forward(x, u, kparams, eps=None, block_b=2048):
    """x: (B, nx), u: (B, ...), eps: (B, ...) or None -> (B, nx) float32."""
    x = x.astype(jnp.float32)
    B, nx = x.shape
    u_flat = u.reshape(B, -1).astype(jnp.float32)

    if eps is None:
        act = jnp.concatenate([x, u_flat], axis=1)
        w1, wskip = kparams["w1"], kparams["wskip"]
    else:
        eps_flat = eps.reshape(B, -1).astype(jnp.float32)
        act = jnp.concatenate([x, u_flat, eps_flat], axis=1)
        w1, wskip = kparams["w1_eps"], kparams["wskip_eps"]

    n_act = act.shape[1]
    hidden = kparams["w2"].shape[0]

    # Batch tile: fat enough to amortize the ~0.35 us/step overhead, but capped at
    # ceil(B/2) (rounded to 8) so large batches always give >=2 grid steps and the
    # "parallel" axis can shard across both v7x TensorCores.
    tb = min(block_b, max(_round_up(pl.cdiv(B, 2), 8), 8))
    grid = (pl.cdiv(B, tb),)

    w_args = (w1, kparams["b1"], kparams["w2"], kparams["b2"],
              kparams["w3"], wskip, kparams["bout"])

    def wspec(arr):           # VMEM-resident weight/bias (same block every step)
        return pl.BlockSpec(arr.shape, lambda i: (0, 0))

    flops = 2 * B * (n_act * hidden + hidden * hidden + hidden * nx + n_act * nx)
    bytes_accessed = int(act.size * act.dtype.itemsize
                         + sum(int(a.size) * a.dtype.itemsize for a in w_args)
                         + B * nx * 4)

    out = pl.pallas_call(
        _ino_kernel,
        grid=grid,
        in_specs=[pl.BlockSpec((tb, n_act), lambda i: (i, 0))]
                 + [wspec(a) for a in w_args],
        out_specs=pl.BlockSpec((tb, nx), lambda i: (i, 0)),
        out_shape=jax.ShapeDtypeStruct((B, nx), jnp.float32),
        compiler_params=pltpu.CompilerParams(
            dimension_semantics=("parallel",),
            vmem_limit_bytes=32 * 1024 * 1024),
        cost_estimate=pl.CostEstimate(flops=flops,
                                      transcendentals=2 * B * hidden,
                                      bytes_accessed=bytes_accessed),
    )(act, *w_args)
    return out


# ---------------------------------------------------------------------------
# Pure-JAX reference (original PyTorch-style math, unfused params)
# ---------------------------------------------------------------------------
def _reference(x, u, raw, eps=None):
    B = x.shape[0]
    net_in = jnp.concatenate([x, u.reshape(B, -1)], axis=1)
    lin = net_in @ raw["wlin"] + raw["blin"]
    h = jnp.tanh(net_in @ raw["w1"] + raw["b1"])
    h = jnp.tanh(h @ raw["w2"] + raw["b2"])
    out = lin + h @ raw["w3"] + raw["b3"]
    if eps is not None:
        out = out + eps.reshape(B, -1) @ raw["K"]
    return out


if __name__ == "__main__":
    # Small shapes consistent with the module: nx=8, nu=4, ny=3, hidden=64, batch=2.
    B, nx, nu, ny, hidden = 2, 8, 4, 3, 64

    key = jax.random.PRNGKey(0)
    kx, ku, keps, kp = jax.random.split(key, 4)
    x = jax.random.normal(kx, (B, nx), jnp.float32)
    u = jax.random.normal(ku, (B, nu), jnp.float32)
    eps = jax.random.normal(keps, (B, ny), jnp.float32)

    raw = init_params(kp, nx, nu, ny, hidden)

    # --- f32 MXU operands: exact path, tight tolerance ---------------------
    kparams_f32 = prepare_kernel_params(raw, mxu_dtype=jnp.float32)

    out = jax.block_until_ready(ino_state_net_forward(x, u, kparams_f32, eps=eps))
    ref = _reference(x, u, raw, eps=eps)
    assert out.shape == (B, nx)
    assert jnp.allclose(out, ref, atol=1e-4, rtol=1e-4), "f32 mismatch with eps"

    out0 = jax.block_until_ready(ino_state_net_forward(x, u, kparams_f32, eps=None))
    ref0 = _reference(x, u, raw, eps=None)
    assert jnp.allclose(out0, ref0, atol=1e-4, rtol=1e-4), "f32 mismatch without eps"

    # --- bf16 MXU operands (v6e/v7x recommendation): loose tolerance -------
    kparams_bf16 = prepare_kernel_params(raw, mxu_dtype=jnp.bfloat16)
    out_bf = jax.block_until_ready(ino_state_net_forward(x, u, kparams_bf16, eps=eps))
    assert jnp.allclose(out_bf, ref, atol=5e-2, rtol=5e-2), "bf16 mismatch with eps"

    print("KERNEL_OK")
</pallas_src>

<mosaic_0001>
module attributes {stable_mosaic.version = 11 : i64} {
  func.func @_ino_kernel(%arg0: i32, %arg1: memref<8x15xf32, #tpu.memory_space<vmem>>, %arg2: memref<15x64xf32, #tpu.memory_space<vmem>>, %arg3: memref<1x64xf32, #tpu.memory_space<vmem>>, %arg4: memref<64x64xf32, #tpu.memory_space<vmem>>, %arg5: memref<1x64xf32, #tpu.memory_space<vmem>>, %arg6: memref<64x8xf32, #tpu.memory_space<vmem>>, %arg7: memref<15x8xf32, #tpu.memory_space<vmem>>, %arg8: memref<1x8xf32, #tpu.memory_space<vmem>>, %arg9: memref<8x8xf32, #tpu.memory_space<vmem>>) attributes {dimension_semantics = [#tpu.dimension_semantics<parallel>], iteration_bounds = array<i64: 1>, scalar_prefetch = 0 : i64, scratch_operands = 0 : i64, tpu.core_type = #tpu.core_type<tc>, window_params = [{transform_indices = @transform_0, window_bounds = array<i64: 8, 15>}, {pipeline_mode = #tpu.pipeline_mode<synchronous>, transform_indices = @transform_1, window_bounds = array<i64: 15, 64>}, {pipeline_mode = #tpu.pipeline_mode<synchronous>, transform_indices = @transform_2, window_bounds = array<i64: 1, 64>}, {pipeline_mode = #tpu.pipeline_mode<synchronous>, transform_indices = @transform_3, window_bounds = array<i64: 64, 64>}, {pipeline_mode = #tpu.pipeline_mode<synchronous>, transform_indices = @transform_4, window_bounds = array<i64: 1, 64>}, {pipeline_mode = #tpu.pipeline_mode<synchronous>, transform_indices = @transform_5, window_bounds = array<i64: 64, 8>}, {pipeline_mode = #tpu.pipeline_mode<synchronous>, transform_indices = @transform_6, window_bounds = array<i64: 15, 8>}, {pipeline_mode = #tpu.pipeline_mode<synchronous>, transform_indices = @transform_7, window_bounds = array<i64: 1, 8>}, {transform_indices = @transform_8, window_bounds = array<i64: 8, 8>}]} {
    %c0 = arith.constant 0 : index
    %c0_0 = arith.constant 0 : index
    %0 = vector.load %arg1[%c0, %c0_0] : memref<8x15xf32, #tpu.memory_space<vmem>>, vector<8x15xf32>
    %c0_1 = arith.constant 0 : index
    %c0_2 = arith.constant 0 : index
    %1 = vector.load %arg2[%c0_1, %c0_2] : memref<15x64xf32, #tpu.memory_space<vmem>>, vector<15x64xf32>
    %cst = arith.constant dense<0.000000e+00> : vector<8x64xf32>
    %2 = tpu.matmul %0, %1, %cst {dimension_numbers = #tpu.dot_dimension_numbers<[1], [0], [0], [1], [0, 0, 1, 1], [], []>} : vector<8x15xf32>, vector<15x64xf32>, vector<8x64xf32> -> vector<8x64xf32>
    %c0_3 = arith.constant 0 : index
    %c0_4 = arith.constant 0 : index
    %3 = vector.load %arg3[%c0_3, %c0_4] : memref<1x64xf32, #tpu.memory_space<vmem>>, vector<1x64xf32>
    %4 = vector.broadcast %3 : vector<1x64xf32> to vector<8x64xf32>
    %5 = arith.addf %2, %4 : vector<8x64xf32>
    %6 = math.tanh %5 : vector<8x64xf32>
    %c0_5 = arith.constant 0 : index
    %c0_6 = arith.constant 0 : index
    %7 = vector.load %arg4[%c0_5, %c0_6] : memref<64x64xf32, #tpu.memory_space<vmem>>, vector<64x64xf32>
    %cst_7 = arith.constant dense<0.000000e+00> : vector<8x64xf32>
    %8 = tpu.matmul %6, %7, %cst_7 {dimension_numbers = #tpu.dot_dimension_numbers<[1], [0], [0], [1], [0, 0, 1, 1], [], []>} : vector<8x64xf32>, vector<64x64xf32>, vector<8x64xf32> -> vector<8x64xf32>
    %c0_8 = arith.constant 0 : index
    %c0_9 = arith.constant 0 : index
    %9 = vector.load %arg5[%c0_8, %c0_9] : memref<1x64xf32, #tpu.memory_space<vmem>>, vector<1x64xf32>
    %10 = vector.broadcast %9 : vector<1x64xf32> to vector<8x64xf32>
    %11 = arith.addf %8, %10 : vector<8x64xf32>
    %12 = math.tanh %11 : vector<8x64xf32>
    %c0_10 = arith.constant 0 : index
    %c0_11 = arith.constant 0 : index
    %13 = vector.load %arg6[%c0_10, %c0_11] : memref<64x8xf32, #tpu.memory_space<vmem>>, vector<64x8xf32>
    %cst_12 = arith.constant dense<0.000000e+00> : vector<8x8xf32>
    %14 = tpu.matmul %12, %13, %cst_12 {dimension_numbers = #tpu.dot_dimension_numbers<[1], [0], [0], [1], [0, 0, 1, 1], [], []>} : vector<8x64xf32>, vector<64x8xf32>, vector<8x8xf32> -> vector<8x8xf32>
    %c0_13 = arith.constant 0 : index
    %c0_14 = arith.constant 0 : index
    %15 = vector.load %arg1[%c0_13, %c0_14] : memref<8x15xf32, #tpu.memory_space<vmem>>, vector<8x15xf32>
    %c0_15 = arith.constant 0 : index
    %c0_16 = arith.constant 0 : index
    %16 = vector.load %arg7[%c0_15, %c0_16] : memref<15x8xf32, #tpu.memory_space<vmem>>, vector<15x8xf32>
    %cst_17 = arith.constant dense<0.000000e+00> : vector<8x8xf32>
    %17 = tpu.matmul %15, %16, %cst_17 {dimension_numbers = #tpu.dot_dimension_numbers<[1], [0], [0], [1], [0, 0, 1, 1], [], []>} : vector<8x15xf32>, vector<15x8xf32>, vector<8x8xf32> -> vector<8x8xf32>
    %18 = arith.addf %14, %17 : vector<8x8xf32>
    %c0_18 = arith.constant 0 : index
    %c0_19 = arith.constant 0 : index
    %19 = vector.load %arg8[%c0_18, %c0_19] : memref<1x8xf32, #tpu.memory_space<vmem>>, vector<1x8xf32>
    %20 = vector.broadcast %19 : vector<1x8xf32> to vector<8x8xf32>
    %21 = arith.addf %18, %20 : vector<8x8xf32>
    %c0_20 = arith.constant 0 : index
    %c0_21 = arith.constant 0 : index
    %22 = vector.load %arg9[%c0_20, %c0_21] : memref<8x8xf32, #tpu.memory_space<vmem>>, vector<8x8xf32>
    tpu.vector_store %arg9[%c0_20, %c0_21], %21 {strides = array<i32>} : memref<8x8xf32, #tpu.memory_space<vmem>>, vector<8x8xf32>,
    return
  }
  func.func @transform_0(%arg0: i32) -> (i32, i32) {
    %c0_i32 = arith.constant 0 : i32
    %c0_i32_0 = arith.constant 0 : i32
    return %arg0, %c0_i32 : i32, i32
  }
  func.func @transform_1(%arg0: i32) -> (i32, i32) {
    %c0_i32 = arith.constant 0 : i32
    %c0_i32_0 = arith.constant 0 : i32
    %c0_i32_1 = arith.constant 0 : i32
    return %c0_i32, %c0_i32_0 : i32, i32
  }
  func.func @transform_2(%arg0: i32) -> (i32, i32) {
    %c0_i32 = arith.constant 0 : i32
    %c0_i32_0 = arith.constant 0 : i32
    %c0_i32_1 = arith.constant 0 : i32
    return %c0_i32, %c0_i32_0 : i32, i32
  }
  func.func @transform_3(%arg0: i32) -> (i32, i32) {
    %c0_i32 = arith.constant 0 : i32
    %c0_i32_0 = arith.constant 0 : i32
    %c0_i32_1 = arith.constant 0 : i32
    return %c0_i32, %c0_i32_0 : i32, i32
  }
  func.func @transform_4(%arg0: i32) -> (i32, i32) {
    %c0_i32 = arith.constant 0 : i32
    %c0_i32_0 = arith.constant 0 : i32
    %c0_i32_1 = arith.constant 0 : i32
    return %c0_i32, %c0_i32_0 : i32, i32
  }
  func.func @transform_5(%arg0: i32) -> (i32, i32) {
    %c0_i32 = arith.constant 0 : i32
    %c0_i32_0 = arith.constant 0 : i32
    %c0_i32_1 = arith.constant 0 : i32
    return %c0_i32, %c0_i32_0 : i32, i32
  }
  func.func @transform_6(%arg0: i32) -> (i32, i32) {
    %c0_i32 = arith.constant 0 : i32
    %c0_i32_0 = arith.constant 0 : i32
    %c0_i32_1 = arith.constant 0 : i32
    return %c0_i32, %c0_i32_0 : i32, i32
  }
  func.func @transform_7(%arg0: i32) -> (i32, i32) {
    %c0_i32 = arith.constant 0 : i32
    %c0_i32_0 = arith.constant 0 : i32
    %c0_i32_1 = arith.constant 0 : i32
    return %c0_i32, %c0_i32_0 : i32, i32
  }
  func.func @transform_8(%arg0: i32) -> (i32, i32) {
    %c0_i32 = arith.constant 0 : i32
    %c0_i32_0 = arith.constant 0 : i32
    return %arg0, %c0_i32 : i32, i32
  }
}

</mosaic_0001>

<bundles_post_ra>
// kernel: tpu_custom_call.1
= control target key start
LH: loop header
LB: loop body
LE: loop exit
PB: predicated region body
PF: predicated region fallthrough
CT: control target
= control target key end

     0   :  { %13 = vsyncpa [#allocation3], 0  ;;  %vm44_vm0 = vcmask 1046528   ;;  %v507_v1 = vmov 0.0   ;;  %vm508_vm1 = vmmov 0   ;;  %vm40_vm2 = vcmask 121856   ;;  %s666_s0 = inlined_call_operand.vmem [shape: f32[2,15], index: 0, kind: input, shape index: {}]   ;;  %s667_s1 = inlined_call_operand.vmem [shape: f32[15,64], index: 1, kind: input, shape index: {}]   ;;  %s668_s2 = inlined_call_operand.vmem [shape: f32[1,64], index: 2, kind: input, shape index: {}]   ;;  %s669_s3 = inlined_call_operand.vmem [shape: f32[64,64], index: 3, kind: input, shape index: {}]   ;;  %s670_s4 = inlined_call_operand.vmem [shape: f32[1,64], index: 4, kind: input, shape index: {}]   ;;  %s671_s5 = inlined_call_operand.vmem [shape: f32[64,8], index: 5, kind: input, shape index: {}]   ;;  %s672_s6 = inlined_call_operand.vmem [shape: f32[15,8], index: 6, kind: input, shape index: {}]   ;;  %s673_s7 = inlined_call_operand.vmem [shape: f32[1,8], index: 7, kind: input, shape index: {}]   ;;  %s674_s8 = inlined_call_operand.hbm [shape: f32[2,8], index: 8, kind: output, shape index: {}]  }
   0x1   :  { %v32_v0 = vld [vmem:[%s667_s1 + $0x8] sm:$0x7f]  ;;  %424 = vmatprep.subr.mxu1 %v507_v1  ;;  %v31_v2 = vld [vmem:[%s667_s1] sm:$0xff]  ;;  %450 = vmatprep.subr.mxu0 %v507_v1  ;;  %v126_v4 = vld [vmem:[%s669_s3 + $0x38] sm:$0xff]  ;;  %vm134_vm3 = vcmask 523264   ;;  %vm373_vm4 = vcmask 64512  }
   0x2   :  { %425 = vmatpush3.msk.msra.mxu1 %vm44_vm0, %v32_v0  ;;  %428 = vmatprep.mubr.msk.f32.mxu1 %vm508_vm1, %v507_v1  ;;  %v30_v3 = vld [vmem:[%s666_s0] sm:$0xff]  ;;  %v125_v5 = vld [vmem:[%s669_s3 + $0x30] sm:$0xff]  ;;  %v124_v6 = vld [vmem:[%s669_s3 + $0x28] sm:$0xff] }
   0x3   :  { %426 = vmatprep.subr.mxu1 %v507_v1  ;;  %454 = vmatprep.mubr.msk.f32.mxu0 %vm508_vm1, %v507_v1  ;;  %v123_v7 = vld [vmem:[%s669_s3 + $0x20] sm:$0xff]  ;;  %v122_v8 = vld [vmem:[%s669_s3 + $0x18] sm:$0xff]  ;;  %v121_v9 = vld [vmem:[%s669_s3 + $0x10] sm:$0xff] }
   0x4   :  { %427 = vmatpush3.msra.mxu1 %v31_v2  ;;  %v120_v10 = vld [vmem:[%s669_s3 + $0x8] sm:$0xff]  ;;  %v119_v11 = vld [vmem:[%s669_s3] sm:$0xff]  ;;  %v216_v19 = vld [vmem:[%s671_s5 + $0x38] sm:$0xff] }
   0x5   :  { %429 = vmatmul.mubr.msk.f32.vlgmr.msra.gmra.mxu1 %vm40_vm2, %v30_v3  ;;  %431 = vmatprep.subr.mxu1 %v507_v1  ;;  %v218_v12 = vld [vmem:[%s672_s6 + $0x8] sm:$0x7f]  ;;  %v217_v13 = vld [vmem:[%s672_s6] sm:$0xff]  ;;  %v215_v20 = vld [vmem:[%s671_s5 + $0x30] sm:$0xff] }
   0x6   :  { %447 = vmatprep.mubr.msk.f32.mxu1 %vm508_vm1, %v507_v1  ;;  %432 = vmatpush3.msra.mxu1 %v126_v4  ;;  %v391_v14 = vld [vmem:[%s668_s2] ss:$0 sm:$0xff]  ;;  %v214_v21 = vld [vmem:[%s671_s5 + $0x28] sm:$0xff]  ;;  %v212_v23 = vld [vmem:[%s671_s5 + $0x18] sm:$0xff] }
   0x7   :  { %433 = vmatprep.subr.mxu1 %v507_v1  ;;  %451 = vmatpush3.msk.msra.mxu0 %vm44_vm0, %v218_v12  ;;  %v213_v22 = vld [vmem:[%s671_s5 + $0x20] sm:$0xff]  ;;  %v211_v24 = vld [vmem:[%s671_s5 + $0x10] sm:$0xff]  ;;  %v210_v25 = vld [vmem:[%s671_s5 + $0x8] sm:$0xff] }
   0x8   :  { %434 = vmatpush3.msra.mxu1 %v125_v5  ;;  %452 = vmatprep.subr.mxu0 %v507_v1  ;;  %v209_v26 = vld [vmem:[%s671_s5] sm:$0xff] }
   0x9   :  { %435 = vmatprep.subr.mxu1 %v507_v1  ;;  %453 = vmatpush3.msra.mxu0 %v217_v13  ;;  %v394_v29 = vld [vmem:[%s670_s4] ss:$0 sm:$0xff] }
   0xa   :  { %436 = vmatpush3.msra.mxu1 %v124_v6  ;;  %455 = vmatmul.mubr.msk.f32.vlgmr.msra.gmra.mxu0 %vm40_vm2, %v30_v3  ;;  %v399_v35 = vld [vmem:[%s673_s7] ss:$0 sm:$0xff] }
   0xb   :  { %437 = vmatprep.subr.mxu1 %v507_v1  ;;  %457 = vmatprep.subr.mxu0 %v507_v1 }
   0xc   :  { %438 = vmatpush3.msra.mxu1 %v123_v7  ;;  %473 = vmatprep.mubr.msk.f32.mxu0 %vm508_vm1, %v507_v1 }
   0xd   :  { %439 = vmatprep.subr.mxu1 %v507_v1  ;;  %458 = vmatpush3.msra.mxu0 %v216_v19 }
   0xe   :  { %440 = vmatpush3.msra.mxu1 %v122_v8  ;;  %459 = vmatprep.subr.mxu0 %v507_v1 }
   0xf   :  { %441 = vmatprep.subr.mxu1 %v507_v1  ;;  %460 = vmatpush3.msra.mxu0 %v215_v20 }
  0x10   :  { %442 = vmatpush3.msra.mxu1 %v121_v9  ;;  %461 = vmatprep.subr.mxu0 %v507_v1 }
  0x11   :  { %443 = vmatprep.subr.mxu1 %v507_v1  ;;  %462 = vmatpush3.msra.mxu0 %v214_v21 }
  0x12   :  { %444 = vmatpush3.msra.mxu1 %v120_v10  ;;  %463 = vmatprep.subr.mxu0 %v507_v1 }
  0x13   :  { %445 = vmatprep.subr.mxu1 %v507_v1  ;;  %464 = vmatpush3.msra.mxu0 %v213_v22 }
  0x14   :  { %446 = vmatpush3.msra.mxu1 %v119_v11  ;;  %465 = vmatprep.subr.mxu0 %v507_v1 }
  0x15   :  { %466 = vmatpush3.msra.mxu0 %v212_v23 }
  0x16   :  { %467 = vmatprep.subr.mxu0 %v507_v1 }
  0x17   :  { %468 = vmatpush3.msra.mxu0 %v211_v24 }
  0x18   :  { %469 = vmatprep.subr.mxu0 %v507_v1 }
  0x19   :  { %470 = vmatpush3.msra.mxu0 %v210_v25 }
  0x1a   :  { %471 = vmatprep.subr.mxu0 %v507_v1 }
  0x1b   :  { %472 = vmatpush3.msra.mxu0 %v209_v26 }
  0xc5   :  { %v114_v15 = vpop.f32.mrf.mxu1 }
  0xc6   :  { %v115_v16 = vadd.f32 %v391_v14, %v114_v15 }
  0xc7   :  { %v430_v17 = vpop.f32.mrf.mxu1 }
  0xc8   :  { %481 = vtanh.f32 %v115_v16 }
  0xca   :  { %v288_v27 = vpop.f32.mrf.mxu0 }
  0xcc   :  { %v456_v28 = vpop.f32.mrf.mxu0 }
  0xd5   :  { %v482_v18 = vpop.eup %481 }
  0xd6   :  { %448 = vmatmul.mubr.msk.f32.vlgmr.msra.gmra.mxu1 %vm134_vm3, %v482_v18 }
 0x196   :  { %v204_v30 = vpop.f32.mrf.mxu1 }
 0x197   :  { %v205_v31 = vadd.f32 %v394_v29, %v204_v30 }
 0x198   :  { %v449_v32 = vpop.f32.mrf.mxu1 }
 0x199   :  { %483 = vtanh.f32 %v205_v31 }
 0x1a6   :  { %v484_v33 = vpop.eup %483 }
 0x1a7   :  { %474 = vmatmul.mubr.msk.f32.vlgmr.msra.gmra.mxu0 %vm134_vm3, %v484_v33 }
 0x267   :  { %v361_v34 = vpop.f32.mrf.mxu0 }
 0x268   :  { %v362_v36 = vadd.f32 %v361_v34, %v288_v27 }
 0x269   :  { %v475_v37 = vpop.f32.mrf.mxu0 }
 0x26a   :  { %v372_v38 = vadd.f32 %v399_v35, %v362_v36 }
 0x26c   :  { %374 = vst.msk [vmem:[#allocation2] sm:$0xff] %vm373_vm4, %v372_v38 }
 0x26d   :  { %379 = vsyncadd [#allocation3], 96  ;;  %s509_s23 = smov [#allocation2]  }
 0x26e   :  { %s380_s4 = sshll.u32 %s509_s23, 4  ;;  %s381_s4 = int_to_ptr.vmem [resolvable:$true] %s380_s4 }
 0x26f   :  { %s485_s24 = scalar_lea.vmem %s381_s4, 32  ;;  %s489_s25 = scalar_lea.vmem %s381_s4, 128 }
 0x270   :  { %p486_p0 = scmp.ne.s32.totalorder %s381_s4, %s485_s24  ;;  %p490_p1 = scmp.lt.s32.totalorder %s381_s4, %s381_s4 }
 0x271   :  { %p491_p2 = scmp.lt.s32.totalorder %s489_s25, %s485_s24 }
 0x273   :  { %p492_p3 = por %p491_p2, %p490_p1 }
 0x275   :  { %p493_p4 = pnand %p492_p3, %p486_p0 }
 0x277   :  { %496 = shalt.err (!%p493_p4)
}
 0x278   :  { %s510_s26 = smov 32   ;;  %s511_s27 = smov 2  }
 0x279   :  { %386 = dma.vmem_to_hbm [thread:$0]  %s381_s4, 32, %s674_s8, [#allocation3], %s510_s26, %s510_s26, %s511_s27  }
 0x27a   :  { %505 = dma.done.wait [#allocation3], 128  }
 0x27b   :  { %506 = vsyncadd [#allocation3], 4294967168 }
 0x27c   :  { %390 = vsyncpa [#allocation3], 1 }

</bundles_post_ra>
